<compile_context>
chip_gen: v7x
topology: tpu7x:2x2x1
jax: 0.10.0
libtpu: 0.0.40
codegen_flags: <defaults>
</compile_context>

<pallas_src>
import functools

import jax
import jax.numpy as jnp
from jax.experimental import pallas as pl
from jax.experimental.pallas import tpu as pltpu


# ---------------------------------------------------------------------------
# Single fused Pallas kernel: net2(net1(x)) with the intermediate in vregs.
# ---------------------------------------------------------------------------
def _two_nets_fused_kernel(x_ref, w1_ref, b1_ref, w2t_ref, b2_ref, o_ref,
                           *, cin, cout):
    """Fused TwoNets forward.

    x_ref   : [B, Cin, HW]     f32  VMEM  (free view of the NCHW input)
    w1_ref  : [Cout, Cin]      f32  SMEM  (1x1 conv weight, read as scalars)
    b1_ref  : [Cout]           f32  SMEM
    w2t_ref : [Cout*HW, N]     bf16 VMEM  (Linear weight transposed once)
    b2_ref  : [1, N]           f32  VMEM
    o_ref   : [B, N]           f32  VMEM  (logits — the only HBM write)
    """
    # Per-input-channel activation slabs ([B, HW], lane-dense, HW = 256).
    # Static middle-axis slices; loaded once, reused across all cout channels.
    x_slabs = [x_ref[:, ci, :] for ci in range(cin)]

    # --- net1: 1x1 conv + ReLU, one [B, HW] slab per output channel --------
    # K = cin = 4 is far too small for the MXU, so it is `cin` VPU broadcast
    # FMAs with scalar weights from SMEM.  Results are cast to bf16 so the
    # single big matmul below runs at native MXU width on v5e/v6e.
    acts = []
    for c in range(cout):
        a_c = w1_ref[c, 0] * x_slabs[0]
        for ci in range(1, cin):
            a_c = a_c + w1_ref[c, ci] * x_slabs[ci]
        a_c = jnp.maximum(a_c + b1_ref[c], 0.0)           # + bias, ReLU
        acts.append(a_c.astype(jnp.bfloat16))

    # --- net2: single MXU contraction --------------------------------------
    # Concatenate along the lane axis: each slab is 256 lanes = 2 full
    # 128-lane groups, so this is pure vreg placement (no XLU shuffles).
    # lhs[b, c*HW + hw] == relu(conv)[b, c, hw]  — exactly torch.flatten's
    # (C, H, W) order, so a plain w2.T is the correct RHS.
    lhs = jnp.concatenate(acts, axis=-1)                   # [B, Cout*HW] bf16
    acc = jnp.dot(lhs, w2t_ref[...],
                  preferred_element_type=jnp.float32)      # [B, N] f32

    o_ref[...] = (acc + b2_ref[...]).astype(o_ref.dtype)


# ---------------------------------------------------------------------------
# One-time weight preparation (layout plumbing moved off the hot path).
# ---------------------------------------------------------------------------
def prepare_params(params):
    w1 = params["w1"].astype(jnp.float32)                  # [Cout, Cin]
    b1 = params["b1"].astype(jnp.float32)                  # [Cout]
    w2 = params["w2"]                                       # [N, Cout*H*W]
    b2 = params["b2"].astype(jnp.float32)                  # [N]
    n = w2.shape[0]
    # Single transpose + bf16 cast: [Cout*H*W, N].  Channel-major rows match
    # torch.flatten's (C, H, W) order, which the kernel's lane-axis concat of
    # per-channel slabs reproduces exactly.
    w2t = w2.T.astype(jnp.bfloat16)                        # [Cout*HW, N] bf16
    return {"w1": w1, "b1": b1, "w2t": w2t, "b2": b2.reshape(1, n)}


# ---------------------------------------------------------------------------
# Jitted forward: one pallas_call, no grid, whole-array operands.
# ---------------------------------------------------------------------------
@jax.jit
def two_nets_forward(x, prepped):
    """TwoNets.forward: net2(net1(x))."""
    B, Cin, H, W = x.shape
    Cout = prepped["w1"].shape[0]
    N = prepped["b2"].shape[1]

    # Free view of the contiguous NCHW input — no transpose, no extra XLA op.
    x3 = x.reshape(B, Cin, H * W)

    kernel = functools.partial(_two_nets_fused_kernel, cin=Cin, cout=Cout)
    return pl.pallas_call(
        kernel,
        out_shape=jax.ShapeDtypeStruct((B, N), jnp.float32),
        # No grid: a single invocation with every operand resident.  Padded
        # VMEM footprint (x3 ~8 KiB, w2t bf16 ~0.5 MiB lane-padded, logits
        # ~1 KiB) is far under the scoped default on every generation.
        in_specs=[
            pl.BlockSpec(memory_space=pltpu.MemorySpace.VMEM),   # x3
            pl.BlockSpec(memory_space=pltpu.MemorySpace.SMEM),   # w1 scalars
            pl.BlockSpec(memory_space=pltpu.MemorySpace.SMEM),   # b1 scalars
            pl.BlockSpec(memory_space=pltpu.MemorySpace.VMEM),   # w2.T (bf16)
            pl.BlockSpec(memory_space=pltpu.MemorySpace.VMEM),   # b2
        ],
        out_specs=pl.BlockSpec(memory_space=pltpu.MemorySpace.VMEM),
        compiler_params=pltpu.CompilerParams(
            vmem_limit_bytes=16 * 1024 * 1024,
        ),
    )(x3, prepped["w1"], prepped["b1"], prepped["w2t"], prepped["b2"])


# ---------------------------------------------------------------------------
# Pure-JAX reference (full f32 path, for correctness check).
# ---------------------------------------------------------------------------
def two_nets_reference(x, params):
    w1, b1, w2, b2 = params["w1"], params["b1"], params["w2"], params["b2"]
    # 1x1 conv NCHW: y[b,co,h,w] = sum_ci w1[co,ci] * x[b,ci,h,w] + b1[co]
    h = jnp.einsum("oc,bchw->bohw", w1, x) + b1[None, :, None, None]
    h = jnp.maximum(h, 0.0)
    h_flat = h.reshape(x.shape[0], -1)
    return h_flat @ w2.T + b2[None, :]


if __name__ == "__main__":
    key = jax.random.PRNGKey(0)
    kx, k1, k2, k3, k4 = jax.random.split(key, 5)

    B, Cin, H, W = 2, 4, 16, 16
    Cout = 8
    num_classes = 10

    x = jax.random.normal(kx, (B, Cin, H, W), dtype=jnp.float32)

    params = {
        "w1": 0.1 * jax.random.normal(k1, (Cout, Cin), dtype=jnp.float32),
        "b1": 0.05 * jax.random.normal(k2, (Cout,), dtype=jnp.float32),
        "w2": 0.02 * jax.random.normal(
            k3, (num_classes, Cout * H * W), dtype=jnp.float32
        ),
        "b2": 0.05 * jax.random.normal(k4, (num_classes,), dtype=jnp.float32),
    }

    prepped = prepare_params(params)

    out = two_nets_forward(x, prepped)
    out = jax.block_until_ready(out)

    ref = two_nets_reference(x, params)
    assert out.shape == (B, num_classes), out.shape
    # bf16 weights/activations with f32 accumulation -> loosened tolerance.
    assert jnp.allclose(out, ref, atol=2e-2, rtol=2e-2), (
        float(jnp.max(jnp.abs(out - ref)))
    )

    print("KERNEL_OK")
</pallas_src>

<mosaic_0001>
module attributes {stable_mosaic.version = 11 : i64} {
  func.func @_two_nets_fused_kernel(%arg0: memref<2x4x256xf32, #tpu.memory_space<vmem>>, %arg1: memref<8x4xf32, #tpu.memory_space<smem>>, %arg2: memref<8xf32, #tpu.memory_space<smem>>, %arg3: memref<2048x10xbf16, #tpu.memory_space<vmem>>, %arg4: memref<1x10xf32, #tpu.memory_space<vmem>>, %arg5: memref<2x10xf32, #tpu.memory_space<vmem>>) attributes {dimension_semantics = [], scalar_prefetch = 0 : i64, scratch_operands = 0 : i64, tpu.core_type = #tpu.core_type<tc>} {
    %c0 = arith.constant 0 : index
    %c0_0 = arith.constant 0 : index
    %c0_1 = arith.constant 0 : index
    %0 = vector.load %arg0[%c0, %c0_0, %c0_1] : memref<2x4x256xf32, #tpu.memory_space<vmem>>, vector<2x1x256xf32>
    %1 = vector.shape_cast %0 : vector<2x1x256xf32> to vector<2x256xf32>
    %c0_2 = arith.constant 0 : index
    %c1 = arith.constant 1 : index
    %c0_3 = arith.constant 0 : index
    %2 = vector.load %arg0[%c0_2, %c1, %c0_3] : memref<2x4x256xf32, #tpu.memory_space<vmem>>, vector<2x1x256xf32>
    %3 = vector.shape_cast %2 : vector<2x1x256xf32> to vector<2x256xf32>
    %c0_4 = arith.constant 0 : index
    %c2 = arith.constant 2 : index
    %c0_5 = arith.constant 0 : index
    %4 = vector.load %arg0[%c0_4, %c2, %c0_5] : memref<2x4x256xf32, #tpu.memory_space<vmem>>, vector<2x1x256xf32>
    %5 = vector.shape_cast %4 : vector<2x1x256xf32> to vector<2x256xf32>
    %c0_6 = arith.constant 0 : index
    %c3 = arith.constant 3 : index
    %c0_7 = arith.constant 0 : index
    %6 = vector.load %arg0[%c0_6, %c3, %c0_7] : memref<2x4x256xf32, #tpu.memory_space<vmem>>, vector<2x1x256xf32>
    %7 = vector.shape_cast %6 : vector<2x1x256xf32> to vector<2x256xf32>
    %c0_8 = arith.constant 0 : index
    %c0_9 = arith.constant 0 : index
    %8 = memref.load %arg1[%c0_8, %c0_9] : memref<8x4xf32, #tpu.memory_space<smem>>
    %9 = vector.broadcast %8 : f32 to vector<2x256xf32>
    %10 = arith.mulf %9, %1 : vector<2x256xf32>
    %c0_10 = arith.constant 0 : index
    %c1_11 = arith.constant 1 : index
    %11 = memref.load %arg1[%c0_10, %c1_11] : memref<8x4xf32, #tpu.memory_space<smem>>
    %12 = vector.broadcast %11 : f32 to vector<2x256xf32>
    %13 = arith.mulf %12, %3 : vector<2x256xf32>
    %14 = arith.addf %10, %13 : vector<2x256xf32>
    %c0_12 = arith.constant 0 : index
    %c2_13 = arith.constant 2 : index
    %15 = memref.load %arg1[%c0_12, %c2_13] : memref<8x4xf32, #tpu.memory_space<smem>>
    %16 = vector.broadcast %15 : f32 to vector<2x256xf32>
    %17 = arith.mulf %16, %5 : vector<2x256xf32>
    %18 = arith.addf %14, %17 : vector<2x256xf32>
    %c0_14 = arith.constant 0 : index
    %c3_15 = arith.constant 3 : index
    %19 = memref.load %arg1[%c0_14, %c3_15] : memref<8x4xf32, #tpu.memory_space<smem>>
    %20 = vector.broadcast %19 : f32 to vector<2x256xf32>
    %21 = arith.mulf %20, %7 : vector<2x256xf32>
    %22 = arith.addf %18, %21 : vector<2x256xf32>
    %c0_16 = arith.constant 0 : index
    %23 = memref.load %arg2[%c0_16] : memref<8xf32, #tpu.memory_space<smem>>
    %24 = vector.broadcast %23 : f32 to vector<2x256xf32>
    %25 = arith.addf %22, %24 : vector<2x256xf32>
    %cst = arith.constant 0.000000e+00 : f32
    %26 = vector.broadcast %cst : f32 to vector<2x256xf32>
    %27 = arith.maximumf %25, %26 : vector<2x256xf32>
    %28 = arith.truncf %27 : vector<2x256xf32> to vector<2x256xbf16>
    %c1_17 = arith.constant 1 : index
    %c0_18 = arith.constant 0 : index
    %29 = memref.load %arg1[%c1_17, %c0_18] : memref<8x4xf32, #tpu.memory_space<smem>>
    %30 = vector.broadcast %29 : f32 to vector<2x256xf32>
    %31 = arith.mulf %30, %1 : vector<2x256xf32>
    %c1_19 = arith.constant 1 : index
    %c1_20 = arith.constant 1 : index
    %32 = memref.load %arg1[%c1_19, %c1_20] : memref<8x4xf32, #tpu.memory_space<smem>>
    %33 = vector.broadcast %32 : f32 to vector<2x256xf32>
    %34 = arith.mulf %33, %3 : vector<2x256xf32>
    %35 = arith.addf %31, %34 : vector<2x256xf32>
    %c1_21 = arith.constant 1 : index
    %c2_22 = arith.constant 2 : index
    %36 = memref.load %arg1[%c1_21, %c2_22] : memref<8x4xf32, #tpu.memory_space<smem>>
    %37 = vector.broadcast %36 : f32 to vector<2x256xf32>
    %38 = arith.mulf %37, %5 : vector<2x256xf32>
    %39 = arith.addf %35, %38 : vector<2x256xf32>
    %c1_23 = arith.constant 1 : index
    %c3_24 = arith.constant 3 : index
    %40 = memref.load %arg1[%c1_23, %c3_24] : memref<8x4xf32, #tpu.memory_space<smem>>
    %41 = vector.broadcast %40 : f32 to vector<2x256xf32>
    %42 = arith.mulf %41, %7 : vector<2x256xf32>
    %43 = arith.addf %39, %42 : vector<2x256xf32>
    %c1_25 = arith.constant 1 : index
    %44 = memref.load %arg2[%c1_25] : memref<8xf32, #tpu.memory_space<smem>>
    %45 = vector.broadcast %44 : f32 to vector<2x256xf32>
    %46 = arith.addf %43, %45 : vector<2x256xf32>
    %cst_26 = arith.constant 0.000000e+00 : f32
    %47 = vector.broadcast %cst_26 : f32 to vector<2x256xf32>
    %48 = arith.maximumf %46, %47 : vector<2x256xf32>
    %49 = arith.truncf %48 : vector<2x256xf32> to vector<2x256xbf16>
    %c2_27 = arith.constant 2 : index
    %c0_28 = arith.constant 0 : index
    %50 = memref.load %arg1[%c2_27, %c0_28] : memref<8x4xf32, #tpu.memory_space<smem>>
    %51 = vector.broadcast %50 : f32 to vector<2x256xf32>
    %52 = arith.mulf %51, %1 : vector<2x256xf32>
    %c2_29 = arith.constant 2 : index
    %c1_30 = arith.constant 1 : index
    %53 = memref.load %arg1[%c2_29, %c1_30] : memref<8x4xf32, #tpu.memory_space<smem>>
    %54 = vector.broadcast %53 : f32 to vector<2x256xf32>
    %55 = arith.mulf %54, %3 : vector<2x256xf32>
    %56 = arith.addf %52, %55 : vector<2x256xf32>
    %c2_31 = arith.constant 2 : index
    %c2_32 = arith.constant 2 : index
    %57 = memref.load %arg1[%c2_31, %c2_32] : memref<8x4xf32, #tpu.memory_space<smem>>
    %58 = vector.broadcast %57 : f32 to vector<2x256xf32>
    %59 = arith.mulf %58, %5 : vector<2x256xf32>
    %60 = arith.addf %56, %59 : vector<2x256xf32>
    %c2_33 = arith.constant 2 : index
    %c3_34 = arith.constant 3 : index
    %61 = memref.load %arg1[%c2_33, %c3_34] : memref<8x4xf32, #tpu.memory_space<smem>>
    %62 = vector.broadcast %61 : f32 to vector<2x256xf32>
    %63 = arith.mulf %62, %7 : vector<2x256xf32>
    %64 = arith.addf %60, %63 : vector<2x256xf32>
    %c2_35 = arith.constant 2 : index
    %65 = memref.load %arg2[%c2_35] : memref<8xf32, #tpu.memory_space<smem>>
    %66 = vector.broadcast %65 : f32 to vector<2x256xf32>
    %67 = arith.addf %64, %66 : vector<2x256xf32>
    %cst_36 = arith.constant 0.000000e+00 : f32
    %68 = vector.broadcast %cst_36 : f32 to vector<2x256xf32>
    %69 = arith.maximumf %67, %68 : vector<2x256xf32>
    %70 = arith.truncf %69 : vector<2x256xf32> to vector<2x256xbf16>
    %c3_37 = arith.constant 3 : index
    %c0_38 = arith.constant 0 : index
    %71 = memref.load %arg1[%c3_37, %c0_38] : memref<8x4xf32, #tpu.memory_space<smem>>
    %72 = vector.broadcast %71 : f32 to vector<2x256xf32>
    %73 = arith.mulf %72, %1 : vector<2x256xf32>
    %c3_39 = arith.constant 3 : index
    %c1_40 = arith.constant 1 : index
    %74 = memref.load %arg1[%c3_39, %c1_40] : memref<8x4xf32, #tpu.memory_space<smem>>
    %75 = vector.broadcast %74 : f32 to vector<2x256xf32>
    %76 = arith.mulf %75, %3 : vector<2x256xf32>
    %77 = arith.addf %73, %76 : vector<2x256xf32>
    %c3_41 = arith.constant 3 : index
    %c2_42 = arith.constant 2 : index
    %78 = memref.load %arg1[%c3_41, %c2_42] : memref<8x4xf32, #tpu.memory_space<smem>>
    %79 = vector.broadcast %78 : f32 to vector<2x256xf32>
    %80 = arith.mulf %79, %5 : vector<2x256xf32>
    %81 = arith.addf %77, %80 : vector<2x256xf32>
    %c3_43 = arith.constant 3 : index
    %c3_44 = arith.constant 3 : index
    %82 = memref.load %arg1[%c3_43, %c3_44] : memref<8x4xf32, #tpu.memory_space<smem>>
    %83 = vector.broadcast %82 : f32 to vector<2x256xf32>
    %84 = arith.mulf %83, %7 : vector<2x256xf32>
    %85 = arith.addf %81, %84 : vector<2x256xf32>
    %c3_45 = arith.constant 3 : index
    %86 = memref.load %arg2[%c3_45] : memref<8xf32, #tpu.memory_space<smem>>
    %87 = vector.broadcast %86 : f32 to vector<2x256xf32>
    %88 = arith.addf %85, %87 : vector<2x256xf32>
    %cst_46 = arith.constant 0.000000e+00 : f32
    %89 = vector.broadcast %cst_46 : f32 to vector<2x256xf32>
    %90 = arith.maximumf %88, %89 : vector<2x256xf32>
    %91 = arith.truncf %90 : vector<2x256xf32> to vector<2x256xbf16>
    %c4 = arith.constant 4 : index
    %c0_47 = arith.constant 0 : index
    %92 = memref.load %arg1[%c4, %c0_47] : memref<8x4xf32, #tpu.memory_space<smem>>
    %93 = vector.broadcast %92 : f32 to vector<2x256xf32>
    %94 = arith.mulf %93, %1 : vector<2x256xf32>
    %c4_48 = arith.constant 4 : index
    %c1_49 = arith.constant 1 : index
    %95 = memref.load %arg1[%c4_48, %c1_49] : memref<8x4xf32, #tpu.memory_space<smem>>
    %96 = vector.broadcast %95 : f32 to vector<2x256xf32>
    %97 = arith.mulf %96, %3 : vector<2x256xf32>
    %98 = arith.addf %94, %97 : vector<2x256xf32>
    %c4_50 = arith.constant 4 : index
    %c2_51 = arith.constant 2 : index
    %99 = memref.load %arg1[%c4_50, %c2_51] : memref<8x4xf32, #tpu.memory_space<smem>>
    %100 = vector.broadcast %99 : f32 to vector<2x256xf32>
    %101 = arith.mulf %100, %5 : vector<2x256xf32>
    %102 = arith.addf %98, %101 : vector<2x256xf32>
    %c4_52 = arith.constant 4 : index
    %c3_53 = arith.constant 3 : index
    %103 = memref.load %arg1[%c4_52, %c3_53] : memref<8x4xf32, #tpu.memory_space<smem>>
    %104 = vector.broadcast %103 : f32 to vector<2x256xf32>
    %105 = arith.mulf %104, %7 : vector<2x256xf32>
    %106 = arith.addf %102, %105 : vector<2x256xf32>
    %c4_54 = arith.constant 4 : index
    %107 = memref.load %arg2[%c4_54] : memref<8xf32, #tpu.memory_space<smem>>
    %108 = vector.broadcast %107 : f32 to vector<2x256xf32>
    %109 = arith.addf %106, %108 : vector<2x256xf32>
    %cst_55 = arith.constant 0.000000e+00 : f32
    %110 = vector.broadcast %cst_55 : f32 to vector<2x256xf32>
    %111 = arith.maximumf %109, %110 : vector<2x256xf32>
    %112 = arith.truncf %111 : vector<2x256xf32> to vector<2x256xbf16>
    %c5 = arith.constant 5 : index
    %c0_56 = arith.constant 0 : index
    %113 = memref.load %arg1[%c5, %c0_56] : memref<8x4xf32, #tpu.memory_space<smem>>
    %114 = vector.broadcast %113 : f32 to vector<2x256xf32>
    %115 = arith.mulf %114, %1 : vector<2x256xf32>
    %c5_57 = arith.constant 5 : index
    %c1_58 = arith.constant 1 : index
    %116 = memref.load %arg1[%c5_57, %c1_58] : memref<8x4xf32, #tpu.memory_space<smem>>
    %117 = vector.broadcast %116 : f32 to vector<2x256xf32>
    %118 = arith.mulf %117, %3 : vector<2x256xf32>
    %119 = arith.addf %115, %118 : vector<2x256xf32>
    %c5_59 = arith.constant 5 : index
    %c2_60 = arith.constant 2 : index
    %120 = memref.load %arg1[%c5_59, %c2_60] : memref<8x4xf32, #tpu.memory_space<smem>>
    %121 = vector.broadcast %120 : f32 to vector<2x256xf32>
    %122 = arith.mulf %121, %5 : vector<2x256xf32>
    %123 = arith.addf %119, %122 : vector<2x256xf32>
    %c5_61 = arith.constant 5 : index
    %c3_62 = arith.constant 3 : index
    %124 = memref.load %arg1[%c5_61, %c3_62] : memref<8x4xf32, #tpu.memory_space<smem>>
    %125 = vector.broadcast %124 : f32 to vector<2x256xf32>
    %126 = arith.mulf %125, %7 : vector<2x256xf32>
    %127 = arith.addf %123, %126 : vector<2x256xf32>
    %c5_63 = arith.constant 5 : index
    %128 = memref.load %arg2[%c5_63] : memref<8xf32, #tpu.memory_space<smem>>
    %129 = vector.broadcast %128 : f32 to vector<2x256xf32>
    %130 = arith.addf %127, %129 : vector<2x256xf32>
    %cst_64 = arith.constant 0.000000e+00 : f32
    %131 = vector.broadcast %cst_64 : f32 to vector<2x256xf32>
    %132 = arith.maximumf %130, %131 : vector<2x256xf32>
    %133 = arith.truncf %132 : vector<2x256xf32> to vector<2x256xbf16>
    %c6 = arith.constant 6 : index
    %c0_65 = arith.constant 0 : index
    %134 = memref.load %arg1[%c6, %c0_65] : memref<8x4xf32, #tpu.memory_space<smem>>
    %135 = vector.broadcast %134 : f32 to vector<2x256xf32>
    %136 = arith.mulf %135, %1 : vector<2x256xf32>
    %c6_66 = arith.constant 6 : index
    %c1_67 = arith.constant 1 : index
    %137 = memref.load %arg1[%c6_66, %c1_67] : memref<8x4xf32, #tpu.memory_space<smem>>
    %138 = vector.broadcast %137 : f32 to vector<2x256xf32>
    %139 = arith.mulf %138, %3 : vector<2x256xf32>
    %140 = arith.addf %136, %139 : vector<2x256xf32>
    %c6_68 = arith.constant 6 : index
    %c2_69 = arith.constant 2 : index
    %141 = memref.load %arg1[%c6_68, %c2_69] : memref<8x4xf32, #tpu.memory_space<smem>>
    %142 = vector.broadcast %141 : f32 to vector<2x256xf32>
    %143 = arith.mulf %142, %5 : vector<2x256xf32>
    %144 = arith.addf %140, %143 : vector<2x256xf32>
    %c6_70 = arith.constant 6 : index
    %c3_71 = arith.constant 3 : index
    %145 = memref.load %arg1[%c6_70, %c3_71] : memref<8x4xf32, #tpu.memory_space<smem>>
    %146 = vector.broadcast %145 : f32 to vector<2x256xf32>
    %147 = arith.mulf %146, %7 : vector<2x256xf32>
    %148 = arith.addf %144, %147 : vector<2x256xf32>
    %c6_72 = arith.constant 6 : index
    %149 = memref.load %arg2[%c6_72] : memref<8xf32, #tpu.memory_space<smem>>
    %150 = vector.broadcast %149 : f32 to vector<2x256xf32>
    %151 = arith.addf %148, %150 : vector<2x256xf32>
    %cst_73 = arith.constant 0.000000e+00 : f32
    %152 = vector.broadcast %cst_73 : f32 to vector<2x256xf32>
    %153 = arith.maximumf %151, %152 : vector<2x256xf32>
    %154 = arith.truncf %153 : vector<2x256xf32> to vector<2x256xbf16>
    %c7 = arith.constant 7 : index
    %c0_74 = arith.constant 0 : index
    %155 = memref.load %arg1[%c7, %c0_74] : memref<8x4xf32, #tpu.memory_space<smem>>
    %156 = vector.broadcast %155 : f32 to vector<2x256xf32>
    %157 = arith.mulf %156, %1 : vector<2x256xf32>
    %c7_75 = arith.constant 7 : index
    %c1_76 = arith.constant 1 : index
    %158 = memref.load %arg1[%c7_75, %c1_76] : memref<8x4xf32, #tpu.memory_space<smem>>
    %159 = vector.broadcast %158 : f32 to vector<2x256xf32>
    %160 = arith.mulf %159, %3 : vector<2x256xf32>
    %161 = arith.addf %157, %160 : vector<2x256xf32>
    %c7_77 = arith.constant 7 : index
    %c2_78 = arith.constant 2 : index
    %162 = memref.load %arg1[%c7_77, %c2_78] : memref<8x4xf32, #tpu.memory_space<smem>>
    %163 = vector.broadcast %162 : f32 to vector<2x256xf32>
    %164 = arith.mulf %163, %5 : vector<2x256xf32>
    %165 = arith.addf %161, %164 : vector<2x256xf32>
    %c7_79 = arith.constant 7 : index
    %c3_80 = arith.constant 3 : index
    %166 = memref.load %arg1[%c7_79, %c3_80] : memref<8x4xf32, #tpu.memory_space<smem>>
    %167 = vector.broadcast %166 : f32 to vector<2x256xf32>
    %168 = arith.mulf %167, %7 : vector<2x256xf32>
    %169 = arith.addf %165, %168 : vector<2x256xf32>
    %c7_81 = arith.constant 7 : index
    %170 = memref.load %arg2[%c7_81] : memref<8xf32, #tpu.memory_space<smem>>
    %171 = vector.broadcast %170 : f32 to vector<2x256xf32>
    %172 = arith.addf %169, %171 : vector<2x256xf32>
    %cst_82 = arith.constant 0.000000e+00 : f32
    %173 = vector.broadcast %cst_82 : f32 to vector<2x256xf32>
    %174 = arith.maximumf %172, %173 : vector<2x256xf32>
    %175 = arith.truncf %174 : vector<2x256xf32> to vector<2x256xbf16>
    %176 = tpu.concatenate %28, %49, %70, %91, %112, %133, %154, %175 in 1 : vector<2x256xbf16>, vector<2x256xbf16>, vector<2x256xbf16>, vector<2x256xbf16>, vector<2x256xbf16>, vector<2x256xbf16>, vector<2x256xbf16>, vector<2x256xbf16> -> vector<2x2048xbf16>
    %c0_83 = arith.constant 0 : index
    %c0_84 = arith.constant 0 : index
    %177 = vector.load %arg3[%c0_83, %c0_84] : memref<2048x10xbf16, #tpu.memory_space<vmem>>, vector<2048x10xbf16>
    %cst_85 = arith.constant dense<0.000000e+00> : vector<2x10xf32>
    %178 = tpu.matmul %176, %177, %cst_85 {dimension_numbers = #tpu.dot_dimension_numbers<[1], [0], [0], [1], [0, 0, 1, 1], [], []>} : vector<2x2048xbf16>, vector<2048x10xbf16>, vector<2x10xf32> -> vector<2x10xf32>
    %c0_86 = arith.constant 0 : index
    %c0_87 = arith.constant 0 : index
    %179 = vector.load %arg4[%c0_86, %c0_87] : memref<1x10xf32, #tpu.memory_space<vmem>>, vector<1x10xf32>
    %180 = vector.broadcast %179 : vector<1x10xf32> to vector<2x10xf32>
    %181 = arith.addf %178, %180 : vector<2x10xf32>
    %c0_88 = arith.constant 0 : index
    %c0_89 = arith.constant 0 : index
    %182 = vector.load %arg5[%c0_88, %c0_89] : memref<2x10xf32, #tpu.memory_space<vmem>>, vector<2x10xf32>
    tpu.vector_store %arg5[%c0_88, %c0_89], %181 {strides = array<i32>} : memref<2x10xf32, #tpu.memory_space<vmem>>, vector<2x10xf32>,
    return
  }
}

</mosaic_0001>

<bundles_post_ra>
// kernel: two_nets_forward.1
= control target key start
LH: loop header
LB: loop body
LE: loop exit
PB: predicated region body
PF: predicated region fallthrough
CT: control target
= control target key end

     0   :  { %10 = vsyncpa [#allocation4], 0  ;;  %s3237_s0 = inlined_call_operand.vmem [shape: f32[2,4,256], index: 0, kind: input, shape index: {}]   ;;  %s3238_s1 = inlined_call_operand.vmem [shape: f32[8,4], index: 1, kind: input, shape index: {}]   ;;  %s3239_s2 = inlined_call_operand.vmem [shape: f32[8], index: 2, kind: input, shape index: {}]   ;;  %s3240_s3 = inlined_call_operand.vmem [shape: bf16[2048,10], index: 3, kind: input, shape index: {}]   ;;  %s3241_s4 = inlined_call_operand.vmem [shape: f32[1,10], index: 4, kind: input, shape index: {}]   ;;  %s3242_s5 = inlined_call_operand.hbm [shape: f32[2,10], index: 5, kind: output, shape index: {}]  }
   0x1   :  { %11 = vsyncpa [#allocation6], 0 }
   0x2   :  { %12 = vsyncpa [#allocation3], 0  ;;  %s21_s20 = sshll.u32 %s3238_s1, 4  ;;  %s31_s23 = sshll.u32 %s3239_s2, 4  ;;  %s22_s20 = int_to_ptr.vmem [resolvable:$true] %s21_s20  ;;  %s32_s23 = int_to_ptr.vmem [resolvable:$true] %s31_s23 }
   0x3   :  { %s2481_s24 = scalar_lea.vmem %s22_s20, 128  ;;  %p2486_p1 = scmp.lt.s32.totalorder %s22_s20, %s22_s20 }
   0x4   :  { %p2482_p0 = scmp.ne.s32.totalorder %s22_s20, %s2481_s24  ;;  %p2487_p2 = scmp.lt.s32.totalorder %s2481_s24, %s2481_s24 }
   0x6   :  { %p2488_p3 = por %p2487_p2, %p2486_p1 }
   0x8   :  { %p2489_p4 = pnand %p2488_p3, %p2482_p0 }
   0xa   :  { %2492 = shalt.err (!%p2489_p4)
}
   0xb   :  { %s2533_s25 = smov [#allocation2]   ;;  %s2493_s26 = scalar_lea.vmem %s32_s23, 16 }
   0xc   :  { %24 = dma.vmem_to_smem %s22_s20, 128, %s2533_s25, [#allocation4]  }
   0xd   :  { %p2494_p5 = scmp.ne.s32.totalorder %s32_s23, %s2493_s26  ;;  %p2498_p6 = scmp.lt.s32.totalorder %s32_s23, %s32_s23 }
   0xe   :  { %p2499_p7 = scmp.lt.s32.totalorder %s2493_s26, %s2493_s26 }
  0x10   :  { %p2500_p8 = por %p2499_p7, %p2498_p6 }
  0x12   :  { %p2501_p9 = pnand %p2500_p8, %p2494_p5 }
  0x14   :  { %2504 = shalt.err (!%p2501_p9)
}
  0x15   :  { %s2534_s1 = smov [#allocation5]  }
  0x16   :  { %34 = dma.vmem_to_smem %s32_s23, 16, %s2534_s1, [#allocation6]  }
  0x17   :  { %2527 = dma.done.wait [#allocation4], 128  }
  0x18   :  { %2528 = vsyncadd [#allocation4], 4294967168 }
  0x19   :  { %2529 = dma.done.wait [#allocation6], 16  }
  0x1a   :  { %2530 = vsyncadd [#allocation6], 4294967280 }
  0x1b   :  { %45 = sfence }
  0x1c   :  { %v2345_v0 = vld [vmem:[%s3240_s3 + $0x40] sm:$0xff]   ;;  %v2349_v4 = vld [vmem:[%s3240_s3 + $0x48] sm:$0xff]   ;;  %v2353_v8 = vld [vmem:[%s3240_s3 + $0x50] sm:$0xff]   ;;  %v92_v32 = vlaneseq  ;;  %s62_s11 = sld [smem:[#allocation2]]  ;;  %s1999_s12 = sld [smem:[#allocation2 + $0x1]]  ;;  %vm503_vm0 = vcmask 1041409  }
  0x1d   :  { %v2346_v1 = vld [vmem:[%s3240_s3 + $0xc0] sm:$0xff]   ;;  %2166 = vmatprep.subr.bf16.mxu0 %v2345_v0  ;;  %v2350_v5 = vld [vmem:[%s3240_s3 + $0xc8] sm:$0xff]   ;;  %v2354_v9 = vld [vmem:[%s3240_s3 + $0xd0] sm:$0xff]   ;;  %s2668_s13 = sld [smem:[#allocation2 + $0x2]]  ;;  %s2670_s14 = sld [smem:[#allocation2 + $0x3]]  ;;  %vm1974_vm1 = vcmask 74752  }
  0x1e   :  { %v2347_v2 = vld [vmem:[%s3240_s3] sm:$0xff]   ;;  %2188 = vmatprep.subr.bf16.mxu1 %v2346_v1  ;;  %v2351_v6 = vld [vmem:[%s3240_s3 + $0x8] sm:$0xff]   ;;  %v2355_v10 = vld [vmem:[%s3240_s3 + $0x10] sm:$0xff]   ;;  %v93_v33 = vshrl.u32 %v92_v32, 7  ;;  %s2692_s23 = sld [smem:[#allocation5]]  ;;  %s2702_s27 = sld [smem:[#allocation2 + $0x81]] }
  0x1f   :  { %v2348_v3 = vld [vmem:[%s3240_s3 + $0x80] sm:$0xff]   ;;  %2167 = vmatpush3.bf16.msra.mxu0 %v2347_v2  ;;  %v2352_v7 = vld [vmem:[%s3240_s3 + $0x88] sm:$0xff]   ;;  %v2356_v11 = vld [vmem:[%s3240_s3 + $0x90] sm:$0xff]   ;;  %s2694_s24 = sld [smem:[#allocation2 + $0x80]]  ;;  %s2704_s28 = sld [smem:[#allocation2 + $0x82]] }
  0x20   :  { %2189 = vmatpush3.bf16.msra.mxu1 %v2348_v3  ;;  %2168 = vmatprep.subr.bf16.mxu0 %v2349_v4  ;;  %v2357_v12 = vld [vmem:[%s3240_s3 + $0x58] sm:$0xff]   ;;  %v2361_v16 = vld [vmem:[%s3240_s3 + $0x60] sm:$0xff]   ;;  %v2365_v20 = vld [vmem:[%s3240_s3 + $0x68] sm:$0xff]   ;;  %v2716_v42 = vsub.s32 1, %v93_v33  ;;  %s2728_s16 = sld [smem:[#allocation2 + $0x83]]  ;;  %s2730_s17 = sld [smem:[#allocation5 + $0x1]] }
  0x21   :  { %2190 = vmatprep.subr.bf16.mxu1 %v2350_v5  ;;  %v2358_v13 = vld [vmem:[%s3240_s3 + $0xd8] sm:$0xff]   ;;  %v2362_v17 = vld [vmem:[%s3240_s3 + $0xe0] sm:$0xff]   ;;  %v2366_v21 = vld [vmem:[%s3240_s3 + $0xe8] sm:$0xff]   ;;  %s2736_s18 = sld [smem:[#allocation2 + $0x100]]  ;;  %s2926_s15 = sld [smem:[#allocation2 + $0x202]] }
  0x22   :  { %v2359_v14 = vld [vmem:[%s3240_s3 + $0x18] sm:$0xff]   ;;  %v2363_v18 = vld [vmem:[%s3240_s3 + $0x20] sm:$0xff]   ;;  %v2367_v22 = vld [vmem:[%s3240_s3 + $0x28] sm:$0xff]   ;;  %v63_v45 = vstv %s62_s11  ;;  %s2742_s11 = sld [smem:[#allocation2 + $0x101]]  ;;  %s2908_s2 = sld [smem:[#allocation2 + $0x200]] }
  0x23   :  { %2169 = vmatpush3.bf16.msra.mxu0 %v2351_v6  ;;  %v2360_v15 = vld [vmem:[%s3240_s3 + $0x98] sm:$0xff]   ;;  %v2364_v19 = vld [vmem:[%s3240_s3 + $0xa0] sm:$0xff]   ;;  %v2368_v23 = vld [vmem:[%s3240_s3 + $0xa8] sm:$0xff]   ;;  %v67_v46 = vstv %s1999_s12  ;;  %s2746_s12 = sld [smem:[#allocation2 + $0x102]]  ;;  %s2020_s7 = sld [smem:[#allocation2 + $0x203]] }
  0x24   :  { %2191 = vmatpush3.bf16.msra.mxu1 %v2352_v7  ;;  %2170 = vmatprep.subr.bf16.mxu0 %v2353_v8  ;;  %v2369_v24 = vld [vmem:[%s3240_s3 + $0x70] sm:$0xff]   ;;  %v2373_v28 = vld [vmem:[%s3240_s3 + $0x78] sm:$0xff]   ;;  %v2675_v34 = vld [vmem:[%s3237_s0] ss:$4 sm:$0x3]  ;;  %v73_v51 = vstv %s2668_s13  ;;  %s2775_s13 = sld [smem:[#allocation2 + $0x103]] }
  0x25   :  { %2192 = vmatprep.subr.bf16.mxu1 %v2354_v9  ;;  %v2370_v25 = vld [vmem:[%s3240_s3 + $0xf0] sm:$0xff]   ;;  %v2374_v29 = vld [vmem:[%s3240_s3 + $0xf8] sm:$0xff]   ;;  %v2680_v35 = vld [vmem:[%s3237_s0 + $0x8] ss:$4 sm:$0x3]  ;;  %v64_v47 = vmul.f32 %v63_v45, %v2675_v34  ;;  %v79_v52 = vstv %s2670_s14  ;;  %s2779_s14 = sld [smem:[#allocation5 + $0x2]] }
  0x26   :  { %v2371_v26 = vld [vmem:[%s3240_s3 + $0x30] sm:$0xff]   ;;  %v2375_v30 = vld [vmem:[%s3240_s3 + $0x38] sm:$0xff]   ;;  %v2685_v36 = vld [vmem:[%s3237_s0 + $0x1] ss:$4 sm:$0x3]  ;;  %v65_v48 = vmul.f32 %v2680_v35, %v63_v45  ;;  %v85_v53 = vstv %s2692_s23  ;;  %s2972_s8 = sld [smem:[#allocation5 + $0x4]] }
  0x27   :  { %2171 = vmatpush3.bf16.msra.mxu0 %v2355_v10  ;;  %v2372_v27 = vld [vmem:[%s3240_s3 + $0xb0] sm:$0xff]   ;;  %v2376_v31 = vld [vmem:[%s3240_s3 + $0xb8] sm:$0xff]   ;;  %v2690_v37 = vld [vmem:[%s3237_s0 + $0x9] ss:$4 sm:$0x3]  ;;  %v68_v49 = vmul.f32 %v2685_v36, %v67_v46  ;;  %v117_v54 = vstv %s2694_s24  ;;  %v2759_v10 = vsub.s32 0, %v93_v33 }
  0x28   :  { %2193 = vmatpush3.bf16.msra.mxu1 %v2356_v11  ;;  %2172 = vmatprep.subr.bf16.mxu0 %v2357_v12  ;;  %v2377_v38 = vld [vmem:[%s3240_s3 + $0x140] sm:$0xff]   ;;  %v2714_v41 = vld [vmem:[%s3237_s0 + $0xa] ss:$4 sm:$0x3]  ;;  %v69_v50 = vmul.f32 %v2690_v37, %v67_v46  ;;  %v118_v61 = vmul.f32 %v117_v54, %v2675_v34  ;;  %v119_v62 = vmul.f32 %v2680_v35, %v117_v54  ;;  %v121_v1 = vstv %s2702_s27  ;;  %s2844_s24 = sld [smem:[#allocation5 + $0x3]]  ;;  %s2912_s27 = sld [smem:[#allocation2 + $0x201]] }
  0x29   :  { %2194 = vmatprep.subr.bf16.mxu1 %v2358_v13  ;;  %v2378_v39 = vld [vmem:[%s3240_s3 + $0x1c0] sm:$0xff]   ;;  %v2726_v44 = vld [vmem:[%s3237_s0 + $0xb] ss:$4 sm:$0x3]  ;;  %v70_v55 = vadd.f32 %v68_v49, %v64_v47  ;;  %v75_v58 = vmul.f32 %v2714_v41, %v73_v51  ;;  %v127_v2 = vstv %s2704_s28  ;;  %v122_v3 = vmul.f32 %v2685_v36, %v121_v1  ;;  %s2022_s9 = sld [smem:[#allocation2 + $0x280]]  ;;  %s2974_s10 = sld [smem:[#allocation2 + $0x281]] }
  0x2a   :  { %v2709_v40 = vld [vmem:[%s3237_s0 + $0x2] ss:$4 sm:$0x3]  ;;  %v2721_v43 = vld [vmem:[%s3237_s0 + $0x3] ss:$4 sm:$0x3]  ;;  %v71_v56 = vadd.f32 %v69_v50, %v65_v48  ;;  %v81_v60 = vmul.f32 %v2726_v44, %v79_v52  ;;  %v123_v4 = vmul.f32 %v2690_v37, %v121_v1  ;;  %v129_v6 = vmul.f32 %v2714_v41, %v127_v2 }
  0x2b   :  { %2173 = vmatpush3.bf16.msra.mxu0 %v2359_v14  ;;  %v74_v57 = vmul.f32 %v2709_v40, %v73_v51  ;;  %v80_v59 = vmul.f32 %v2721_v43, %v79_v52  ;;  %v128_v5 = vmul.f32 %v2709_v40, %v127_v2  ;;  %v133_v9 = vstv %s2728_s16  ;;  %s2012_s16 = sld [smem:[#allocation2 + $0x180]]  ;;  %s2995_s23 = sld [smem:[#allocation5 + $0x5]] }
  0x2c   :  { %2195 = vmatpush3.bf16.msra.mxu1 %v2360_v15  ;;  %2174 = vmatprep.subr.bf16.mxu0 %v2361_v16  ;;  %v77_v0 = vadd.f32 %v75_v58, %v71_v56  ;;  %v124_v11 = vadd.f32 %v122_v3, %v118_v61  ;;  %v125_v12 = vadd.f32 %v123_v4, %v119_v62  ;;  %s3077_s6 = sld [smem:[#allocation2 + $0x302]]  ;;  %s3120_s29 = sld [smem:[#allocation2 + $0x303]] }
  0x2d   :  { %2196 = vmatprep.subr.bf16.mxu1 %v2362_v17  ;;  %v76_v63 = vadd.f32 %v74_v57, %v70_v55  ;;  %v134_v13 = vmul.f32 %v2721_v43, %v133_v9  ;;  %v135_v14 = vmul.f32 %v2726_v44, %v133_v9  ;;  %v139_v17 = vstv %s2730_s17  ;;  %s2824_s17 = sld [smem:[#allocation2 + $0x181]]  ;;  %s3143_s19 = sld [smem:[#allocation2 + $0x383]] }
  0x2e   :  { %v83_v8 = vadd.f32 %v81_v60, %v77_v0  ;;  %s3155_s26 = sld [smem:[#allocation5 + $0x7]] }
  0x2f   :  { %2175 = vmatpush3.bf16.msra.mxu0 %v2363_v18  ;;  %v82_v7 = vadd.f32 %v80_v59, %v76_v63  ;;  %v171_v18 = vstv %s2736_s18  ;;  %s2827_s18 = sld [smem:[#allocation2 + $0x182]] }
  0x30   :  { %2197 = vmatpush3.bf16.msra.mxu1 %v2364_v19  ;;  %2176 = vmatprep.subr.bf16.mxu0 %v2365_v20  ;;  %v87_v16 = vadd.f32 %v85_v53, %v83_v8  ;;  %v130_v19 = vadd.f32 %v128_v5, %v124_v11  ;;  %v131_v20 = vadd.f32 %v129_v6, %v125_v12  ;;  %v187_v11 = vstv %s2775_s13 }
  0x31   :  { %2198 = vmatprep.subr.bf16.mxu1 %v2366_v21  ;;  %v86_v15 = vadd.f32 %v85_v53, %v82_v7  ;;  %v172_v21 = vmul.f32 %v171_v18, %v2675_v34 }
  0x33   :  { %2177 = vmatpush3.bf16.msra.mxu0 %v2367_v22  ;;  %v173_v22 = vmul.f32 %v2680_v35, %v171_v18 }
  0x34   :  { %2199 = vmatpush3.bf16.msra.mxu1 %v2368_v23  ;;  %2178 = vmatprep.subr.bf16.mxu0 %v2369_v24  ;;  %v88_v23 = vmax.f32 %v86_v15, 0.0  ;;  %v89_v24 = vmax.f32 %v87_v16, 0.0  ;;  %v2379_v16 = vld [vmem:[%s3240_s3 + $0x100] sm:$0xff]  }
  0x35   :  { %2200 = vmatprep.subr.bf16.mxu1 %v2370_v25  ;;  %v175_v25 = vstv %s2742_s11  ;;  %s2829_s11 = sld [smem:[#allocation2 + $0x183]] }
  0x36   :  { %v107_v32 = vrot.slane %v89_v24, %v2716_v42  ;;  %v95_v33 = vrot.slane %v88_v23, %v2759_v10 }
  0x37   :  { %2179 = vmatpush3.bf16.msra.mxu0 %v2371_v26  ;;  %v181_v26 = vstv %s2746_s12  ;;  %s2984_s12 = sld [smem:[#allocation2 + $0x283]] }
  0x38   :  { %2201 = vmatpush3.bf16.msra.mxu1 %v2372_v27  ;;  %2180 = vmatprep.subr.bf16.mxu0 %v2373_v28  ;;  %v136_v27 = vadd.f32 %v134_v13, %v130_v19  ;;  %v137_v28 = vadd.f32 %v135_v14, %v131_v20  ;;  %v115_v49 = vpack.c.bf16 %v107_v32, %v107_v32  ;;  %v2381_v19 = vld [vmem:[%s3240_s3 + $0x148] sm:$0xff]   ;;  %v2385_v32 = vld [vmem:[%s3240_s3 + $0x150] sm:$0xff]  }
  0x39   :  { %2202 = vmatprep.subr.bf16.mxu1 %v2374_v29  ;;  %v176_v29 = vmul.f32 %v2685_v36, %v175_v25  ;;  %v112_v50 = vpack.c.bf16 %v95_v33, %v95_v33  ;;  %v182_v54 = vmul.f32 %v2709_v40, %v181_v26  ;;  %v183_v55 = vmul.f32 %v2714_v41, %v181_v26 }
  0x3a   :  { %v141_v45 = vadd.f32 %v139_v17, %v137_v28  ;;  %v501_v57 = vunpack.c.l.b16 %v115_v49  ;;  %v188_v20 = vmul.f32 %v2721_v43, %v187_v11 }
  0x3b   :  { %2181 = vmatpush3.bf16.msra.mxu0 %v2375_v30  ;;  %v177_v30 = vmul.f32 %v2690_v37, %v175_v25  ;;  %v178_v46 = vadd.f32 %v176_v29, %v172_v21  ;;  %v498_v58 = vunpack.c.l.b16 %v112_v50  ;;  %v189_v21 = vmul.f32 %v2726_v44, %v187_v11  ;;  %v2380_v25 = vld [vmem:[%s3240_s3 + $0x180] sm:$0xff]   ;;  %v2383_v29 = vld [vmem:[%s3240_s3 + $0x108] sm:$0xff]   ;;  %v2386_v50 = vld [vmem:[%s3240_s3 + $0x1d0] sm:$0xff]  }
  0x3c   :  { %2203 = vmatpush3.bf16.msra.mxu1 %v2376_v31  ;;  %2210 = vmatprep.subr.bf16.mxu0 %v2377_v38  ;;  %v99_v31 = vrot.slane %v88_v23, %v2716_v42  ;;  %v103_v38 = vrot.slane %v89_v24, %v2759_v10  ;;  %v143_v53 = vmax.f32 %v141_v45, 0.0  ;;  %v505_v0 = vrot.slane %v501_v57, 7  ;;  %v2382_v45 = vld [vmem:[%s3240_s3 + $0x1c8] sm:$0xff]   ;;  %v2390_v57 = vld [vmem:[%s3240_s3 + $0x1d8] sm:$0xff]  }
  0x3d   :  { %2232 = vmatprep.subr.bf16.mxu1 %v2378_v39  ;;  %v140_v39 = vadd.f32 %v139_v17, %v136_v27  ;;  %v179_v47 = vadd.f32 %v177_v30, %v173_v22  ;;  %v184_v2 = vadd.f32 %v182_v54, %v178_v46  ;;  %v193_v23 = vstv %s2779_s14  ;;  %v2384_v46 = vld [vmem:[%s3240_s3 + $0x188] sm:$0xff]   ;;  %v2388_v54 = vld [vmem:[%s3240_s3 + $0x190] sm:$0xff]  }
  0x3e   :  { %v113_v48 = vpack.c.bf16 %v99_v31, %v99_v31  ;;  %v114_v51 = vpack.c.bf16 %v103_v38, %v103_v38  ;;  %v161_v61 = vrot.slane %v143_v53, %v2716_v42  ;;  %v157_v63 = vrot.slane %v143_v53, %v2759_v10 }
  0x3f   :  { %v142_v52 = vmax.f32 %v140_v39, 0.0  ;;  %v185_v9 = vadd.f32 %v183_v55, %v179_v47  ;;  %v190_v26 = vadd.f32 %v188_v20, %v184_v2 }
  0x40   :  { %v499_v56 = vunpack.c.l.b16 %v113_v48  ;;  %v500_v59 = vunpack.c.l.b16 %v114_v51  ;;  %v169_v4 = vpack.c.bf16 %v161_v61, %v161_v61  ;;  %v168_v6 = vpack.c.bf16 %v157_v63, %v157_v63  ;;  %v2387_v48 = vld [vmem:[%s3240_s3 + $0x110] sm:$0xff]   ;;  %v2389_v51 = vld [vmem:[%s3240_s3 + $0x158] sm:$0xff]  }
  0x41   :  { %v153_v60 = vrot.slane %v142_v52, %v2716_v42  ;;  %v149_v62 = vrot.slane %v142_v52, %v2759_v10  ;;  %v191_v27 = vadd.f32 %v189_v21, %v185_v9  ;;  %v194_v33 = vadd.f32 %v193_v23, %v190_v26  ;;  %v2392_v63 = vld [vmem:[%s3240_s3 + $0x198] sm:$0xff]   ;;  %v2397_v9 = vld [vmem:[%s3240_s3 + $0x168] sm:$0xff]  }
  0x42   :  { %v502_v1 = vrot.slane %v500_v59, 7  ;;  %v506_v7 = vsel %vm503_vm0, %v505_v0, %v499_v56  ;;  %v518_v14 = vunpack.c.l.b16 %v169_v4  ;;  %v517_v18 = vunpack.c.l.b16 %v168_v6  ;;  %v2395_v4 = vld [vmem:[%s3240_s3 + $0x120] sm:$0xff]  }
  0x43   :  { %v167_v3 = vpack.c.bf16 %v153_v60, %v153_v60  ;;  %v166_v5 = vpack.c.bf16 %v149_v62, %v149_v62  ;;  %v508_v12 = vpack.c.b16 %v506_v7, %v506_v7  ;;  %v195_v38 = vadd.f32 %v193_v23, %v191_v27  ;;  %v2393_v60 = vld [vmem:[%s3240_s3 + $0x160] sm:$0xff]  }
  0x44   :  { %v504_v8 = vsel %vm503_vm0, %v502_v1, %v498_v58  ;;  %v521_v22 = vrot.slane %v518_v14, 7  ;;  %v519_v24 = vrot.slane %v517_v18, 7  ;;  %v196_v47 = vmax.f32 %v194_v33, 0.0  ;;  %v2391_v58 = vld [vmem:[%s3240_s3 + $0x118] sm:$0xff]   ;;  %v2394_v14 = vld [vmem:[%s3240_s3 + $0x1e0] sm:$0xff]   ;;  %v2400_v33 = vld [vmem:[%s3240_s3 + $0x1a8] sm:$0xff]  }
  0x45   :  { %v516_v13 = vunpack.c.l.b16 %v167_v3  ;;  %v507_v15 = vpack.c.b16 %v504_v8, %v504_v8  ;;  %v515_v17 = vunpack.c.l.b16 %v166_v5  ;;  %1686 = vmatprep.mubr.bf16.mxu0 %v508_v12  ;;  %v197_v49 = vmax.f32 %v195_v38, 0.0 }
  0x46   :  { %v207_v52 = vrot.slane %v196_v47, %v2716_v42  ;;  %v225_v0 = vstv %s2012_s16  ;;  %v229_v1 = vstv %s2824_s17  ;;  %v203_v2 = vrot.slane %v196_v47, %v2759_v10  ;;  %s2032_s16 = sld [smem:[#allocation2 + $0x380]] }
  0x47   :  { %1687 = vmatmul.mubr.bf16.vlgmr.msra.gmra.mrb[0].mxu0 %v507_v15  ;;  %v522_v28 = vsel %vm503_vm0, %v521_v22, %v516_v13  ;;  %v520_v31 = vsel %vm503_vm0, %v519_v24, %v515_v17  ;;  %v215_v53 = vrot.slane %v197_v49, %v2716_v42  ;;  %v211_v56 = vrot.slane %v197_v49, %v2759_v10  ;;  %v2399_v24 = vld [vmem:[%s3240_s3 + $0x128] sm:$0xff]   ;;  %v2405_v49 = vld [vmem:[%s3240_s3 + $0x178] sm:$0xff]  }
  0x48   :  { %2211 = vmatpush3.bf16.msra.mxu0 %v2379_v16  ;;  %v524_v30 = vpack.c.b16 %v522_v28, %v522_v28  ;;  %v523_v39 = vpack.c.b16 %v520_v31, %v520_v31  ;;  %v221_v55 = vpack.c.bf16 %v207_v52, %v207_v52  ;;  %v226_v6 = vmul.f32 %v225_v0, %v2675_v34  ;;  %v2401_v28 = vld [vmem:[%s3240_s3 + $0x170] sm:$0xff]  }
  0x49   :  { %2212 = vmatprep.subr.bf16.mxu0 %v2381_v19  ;;  %v223_v59 = vpack.c.bf16 %v215_v53, %v215_v53  ;;  %v222_v3 = vpack.c.bf16 %v211_v56, %v211_v56  ;;  %v227_v7 = vmul.f32 %v2680_v35, %v225_v0  ;;  %v230_v8 = vmul.f32 %v2685_v36, %v229_v1  ;;  %v2396_v19 = vld [vmem:[%s3240_s3 + $0x1a0] sm:$0xff]   ;;  %v2404_v53 = vld [vmem:[%s3240_s3 + $0x1b0] sm:$0xff]   ;;  %v2408_v0 = vld [vmem:[%s3240_s3 + $0x1b8] sm:$0xff]  }
  0x4a   :  { %1726 = vmatprep.mubr.bf16.mxu1 %v524_v30  ;;  %v532_v61 = vunpack.c.l.b16 %v221_v55  ;;  %v231_v11 = vmul.f32 %v2690_v37, %v229_v1  ;;  %v235_v12 = vstv %s2827_s18  ;;  %v241_v13 = vstv %s2829_s11  ;;  %v2398_v30 = vld [vmem:[%s3240_s3 + $0x1e8] sm:$0xff]   ;;  %v2409_v55 = vld [vmem:[%s3240_s3 + $0x240] sm:$0xff]   ;;  %s3136_s11 = sld [smem:[#allocation2 + $0x381]] }
  0x4b   :  { %1727 = vmatmul.mubr.bf16.vlgmr.msra.gmra.mrb[0].mxu1 %v523_v39  ;;  %v534_v62 = vunpack.c.l.b16 %v223_v59  ;;  %v232_v16 = vadd.f32 %v230_v8, %v226_v6  ;;  %v236_v17 = vmul.f32 %v2709_v40, %v235_v12  ;;  %v237_v18 = vmul.f32 %v2714_v41, %v235_v12  ;;  %v2402_v39 = vld [vmem:[%s3240_s3 + $0x1f0] sm:$0xff]  }
  0x4c   :  { %2213 = vmatpush3.bf16.msra.mxu0 %v2383_v29  ;;  %2233 = vmatpush3.bf16.msra.mxu1 %v2380_v25  ;;  %v233_v21 = vadd.f32 %v231_v11, %v227_v7  ;;  %v242_v22 = vmul.f32 %v2721_v43, %v241_v13  ;;  %v243_v23 = vmul.f32 %v2726_v44, %v241_v13  ;;  %v533_v27 = vunpack.c.l.b16 %v222_v3  ;;  %v2410_v11 = vld [vmem:[%s3240_s3 + $0x2c0] sm:$0xff]  }
  0x4d   :  { %2214 = vmatprep.subr.bf16.mxu0 %v2385_v32  ;;  %2234 = vmatprep.subr.bf16.mxu1 %v2382_v45  ;;  %v537_v5 = vrot.slane %v534_v62, 7  ;;  %v238_v25 = vadd.f32 %v236_v17, %v232_v16  ;;  %v220_v26 = vpack.c.bf16 %v203_v2, %v203_v2  ;;  %v247_v32 = vstv %s2844_s24  ;;  %v2403_v45 = vld [vmem:[%s3240_s3 + $0x130] sm:$0xff]   ;;  %s3057_s24 = sld [smem:[#allocation2 + $0x301]] }
  0x4e   :  { %v239_v29 = vadd.f32 %v237_v18, %v233_v21  ;;  %v279_v18 = vstv %s2908_s2 }
  0x4f   :  { %v538_v15 = vsel %vm503_vm0, %v537_v5, %v532_v61  ;;  %v244_v31 = vadd.f32 %v242_v22, %v238_v25  ;;  %v531_v47 = vunpack.c.l.b16 %v220_v26  ;;  %v2406_v61 = vld [vmem:[%s3240_s3 + $0x1f8] sm:$0xff]   ;;  %v2413_v5 = vld [vmem:[%s3240_s3 + $0x248] sm:$0xff]   ;;  %v2412_v22 = vld [vmem:[%s3240_s3 + $0x280] sm:$0xff]  }
  0x50   :  { %2215 = vmatpush3.bf16.msra.mxu0 %v2387_v48  ;;  %2235 = vmatpush3.bf16.msra.mxu1 %v2384_v46  ;;  %v540_v20 = vpack.c.b16 %v538_v15, %v538_v15  ;;  %v245_v38 = vadd.f32 %v243_v23, %v239_v29  ;;  %v535_v48 = vrot.slane %v533_v27, 7  ;;  %v2417_v15 = vld [vmem:[%s3240_s3 + $0x250] sm:$0xff]   ;;  %v2414_v23 = vld [vmem:[%s3240_s3 + $0x2c8] sm:$0xff]   ;;  %v281_v27 = vmul.f32 %v2680_v35, %v279_v18 }
  0x51   :  { %2216 = vmatprep.subr.bf16.mxu0 %v2389_v51  ;;  %2236 = vmatprep.subr.bf16.mxu1 %v2386_v50  ;;  %v248_v46 = vadd.f32 %v247_v32, %v244_v31  ;;  %v2407_v51 = vld [vmem:[%s3240_s3 + $0x138] sm:$0xff]   ;;  %v2416_v25 = vld [vmem:[%s3240_s3 + $0x288] sm:$0xff]   ;;  %v2419_v26 = vld [vmem:[%s3240_s3 + $0x210] sm:$0xff]   ;;  %v289_v31 = vstv %s2926_s15  ;;  %s2976_s15 = sld [smem:[#allocation2 + $0x282]] }
  0x52   :  { %1766 = vmatprep.mubr.bf16.mxu0 %v540_v20  ;;  %v249_v50 = vadd.f32 %v247_v32, %v245_v38  ;;  %v2418_v32 = vld [vmem:[%s3240_s3 + $0x2d0] sm:$0xff]   ;;  %v2425_v38 = vld [vmem:[%s3240_s3 + $0x260] sm:$0xff]  }
  0x53   :  { %v250_v52 = vmax.f32 %v248_v46, 0.0  ;;  %v290_v46 = vmul.f32 %v2709_v40, %v289_v31 }
  0x54   :  { %2217 = vmatpush3.bf16.msra.mxu0 %v2391_v58  ;;  %2237 = vmatpush3.bf16.msra.mxu1 %v2388_v54  ;;  %v251_v54 = vmax.f32 %v249_v50, 0.0  ;;  %v2427_v50 = vld [vmem:[%s3240_s3 + $0x220] sm:$0xff]  }
  0x55   :  { %2218 = vmatprep.subr.bf16.mxu0 %v2393_v60  ;;  %2238 = vmatprep.subr.bf16.mxu1 %v2390_v57  ;;  %v261_v56 = vrot.slane %v250_v52, %v2716_v42  ;;  %v536_v57 = vsel %vm503_vm0, %v535_v48, %v531_v47  ;;  %v257_v58 = vrot.slane %v250_v52, %v2759_v10  ;;  %v2420_v48 = vld [vmem:[%s3240_s3 + $0x290] sm:$0xff]   ;;  %v2429_v52 = vld [vmem:[%s3240_s3 + $0x268] sm:$0xff]  }
  0x56   :  { %v269_v59 = vrot.slane %v251_v54, %v2716_v42  ;;  %v265_v60 = vrot.slane %v251_v54, %v2759_v10  ;;  %v539_v2 = vpack.c.b16 %v536_v57, %v536_v57  ;;  %v291_v47 = vmul.f32 %v2714_v41, %v289_v31 }
  0x57   :  { %v275_v62 = vpack.c.bf16 %v261_v56, %v261_v56  ;;  %v2426_v56 = vld [vmem:[%s3240_s3 + $0x2e0] sm:$0xff]  }
  0x58   :  { %2219 = vmatpush3.bf16.msra.mxu0 %v2395_v4  ;;  %2239 = vmatpush3.bf16.msra.mxu1 %v2392_v63  ;;  %v274_v63 = vpack.c.bf16 %v257_v58, %v257_v58  ;;  %v277_v1 = vpack.c.bf16 %v269_v59, %v269_v59  ;;  %v276_v3 = vpack.c.bf16 %v265_v60, %v265_v60  ;;  %v2411_v4 = vld [vmem:[%s3240_s3 + $0x200] sm:$0xff]   ;;  %v301_v59 = vstv %s2972_s8 }
  0x59   :  { %2220 = vmatprep.subr.bf16.mxu0 %v2397_v9  ;;  %2240 = vmatprep.subr.bf16.mxu1 %v2394_v14  ;;  %v548_v6 = vunpack.c.l.b16 %v275_v62  ;;  %v2415_v14 = vld [vmem:[%s3240_s3 + $0x208] sm:$0xff]   ;;  %v333_v60 = vstv %s2022_s9 }
  0x5a   :  { %v550_v7 = vunpack.c.l.b16 %v277_v1  ;;  %v547_v8 = vunpack.c.l.b16 %v274_v63  ;;  %v549_v9 = vunpack.c.l.b16 %v276_v3  ;;  %v335_v62 = vmul.f32 %v2680_v35, %v333_v60  ;;  %v2431_v1 = vld [vmem:[%s3240_s3 + $0x228] sm:$0xff]  }
  0x5b   :  { %v337_v63 = vstv %s2974_s10 }
  0x5c   :  { %2221 = vmatpush3.bf16.msra.mxu0 %v2399_v24  ;;  %2241 = vmatpush3.bf16.msra.mxu1 %v2396_v19  ;;  %v553_v12 = vrot.slane %v550_v7, 7  ;;  %v551_v13 = vrot.slane %v549_v9, 7  ;;  %v283_v19 = vstv %s2912_s27  ;;  %v280_v24 = vmul.f32 %v279_v18, %v2675_v34 }
  0x5d   :  { %2222 = vmatprep.subr.bf16.mxu0 %v2401_v28  ;;  %2242 = vmatprep.subr.bf16.mxu1 %v2398_v30  ;;  %v284_v28 = vmul.f32 %v2685_v36, %v283_v19  ;;  %v285_v29 = vmul.f32 %v2690_v37, %v283_v19  ;;  %v2421_v30 = vld [vmem:[%s3240_s3 + $0x258] sm:$0xff]   ;;  %v349_v7 = vstv %s2984_s12  ;;  %s3138_s12 = sld [smem:[#allocation2 + $0x382]] }
  0x5e   :  { %v554_v16 = vsel %vm503_vm0, %v553_v12, %v548_v6  ;;  %v552_v17 = vsel %vm503_vm0, %v551_v13, %v547_v8  ;;  %v2428_v8 = vld [vmem:[%s3240_s3 + $0x2a0] sm:$0xff]   ;;  %v2430_v12 = vld [vmem:[%s3240_s3 + $0x2e8] sm:$0xff]  }
  0x5f   :  { %v556_v20 = vpack.c.b16 %v554_v16, %v554_v16  ;;  %v555_v21 = vpack.c.b16 %v552_v17, %v552_v17  ;;  %v2432_v13 = vld [vmem:[%s3240_s3 + $0x2a8] sm:$0xff]  }
  0x60   :  { %2223 = vmatpush3.bf16.msra.mxu0 %v2403_v45  ;;  %2243 = vmatpush3.bf16.msra.mxu1 %v2400_v33  ;;  %v2423_v33 = vld [vmem:[%s3240_s3 + $0x218] sm:$0xff]   ;;  %v287_v45 = vadd.f32 %v285_v29, %v281_v27  ;;  %v2436_v27 = vld [vmem:[%s3240_s3 + $0x2b0] sm:$0xff]  }
  0x61   :  { %2224 = vmatprep.subr.bf16.mxu0 %v2405_v49  ;;  %2244 = vmatprep.subr.bf16.mxu1 %v2402_v39  ;;  %v286_v39 = vadd.f32 %v284_v28, %v280_v24  ;;  %v2422_v49 = vld [vmem:[%s3240_s3 + $0x2d8] sm:$0xff]  }
  0x62   :  { %1806 = vmatprep.mubr.bf16.mxu1 %v556_v20  ;;  %v293_v54 = vadd.f32 %v291_v47, %v287_v45  ;;  %v2439_v24 = vld [vmem:[%s3240_s3 + $0x238] sm:$0xff]  }
  0x64   :  { %2225 = vmatpush3.bf16.msra.mxu0 %v2407_v51  ;;  %2245 = vmatpush3.bf16.msra.mxu1 %v2404_v53  ;;  %v2424_v51 = vld [vmem:[%s3240_s3 + $0x298] sm:$0xff]   ;;  %v292_v53 = vadd.f32 %v290_v46, %v286_v39 }
  0x65   :  { %2254 = vmatprep.subr.bf16.mxu0 %v2409_v55  ;;  %2246 = vmatprep.subr.bf16.mxu1 %v2406_v61  ;;  %v295_v55 = vstv %s2020_s7  ;;  %v334_v61 = vmul.f32 %v333_v60, %v2675_v34  ;;  %v2433_v34 = vld [vmem:[%s3240_s3 + $0x270] sm:$0xff]  }
  0x66   :  { %v296_v57 = vmul.f32 %v2721_v43, %v295_v55  ;;  %v297_v58 = vmul.f32 %v2726_v44, %v295_v55 }
  0x67   :  { %1767 = vmatmul.mubr.bf16.vlgmr.msra.gmra.mrb[4].mxu0 %v539_v2 }
  0x68   :  { %2255 = vmatpush3.bf16.msra.mxu0 %v2411_v4  ;;  %2247 = vmatpush3.bf16.msra.mxu1 %v2408_v0  ;;  %v343_v0 = vstv %s2976_s15  ;;  %v298_v2 = vadd.f32 %v296_v57, %v292_v53  ;;  %v299_v3 = vadd.f32 %v297_v58, %v293_v54  ;;  %v338_v4 = vmul.f32 %v2685_v36, %v337_v63  ;;  %v2442_v58 = vld [vmem:[%s3240_s3 + $0x3c0] sm:$0xff]   ;;  %s3131_s15 = sld [smem:[#allocation5 + $0x6]] }
  0x69   :  { %2256 = vmatprep.subr.bf16.mxu0 %v2413_v5  ;;  %2276 = vmatprep.subr.bf16.mxu1 %v2410_v11  ;;  %v339_v5 = vmul.f32 %v2690_v37, %v337_v63  ;;  %v344_v35 = vmul.f32 %v2709_v40, %v343_v0  ;;  %v345_v6 = vmul.f32 %v2714_v41, %v343_v0  ;;  %v2443_v63 = vld [vmem:[%s3240_s3 + $0x300] sm:$0xff]  }
  0x6a   :  { %v302_v9 = vadd.f32 %v301_v59, %v298_v2  ;;  %v303_v11 = vadd.f32 %v301_v59, %v299_v3  ;;  %v340_v36 = vadd.f32 %v338_v4, %v334_v61  ;;  %v350_v40 = vmul.f32 %v2721_v43, %v349_v7  ;;  %v2445_v3 = vld [vmem:[%s3240_s3 + $0x348] sm:$0xff]  }
  0x6b   :  { %1807 = vmatmul.mubr.bf16.vlgmr.msra.gmra.mrb[4].mxu1 %v555_v21  ;;  %v341_v37 = vadd.f32 %v339_v5, %v335_v62  ;;  %v351_v41 = vmul.f32 %v2726_v44, %v349_v7  ;;  %v355_v43 = vstv %s2995_s23  ;;  %v2434_v44 = vld [vmem:[%s3240_s3 + $0x2f0] sm:$0xff]   ;;  %s3055_s23 = sld [smem:[#allocation2 + $0x300]] }
  0x6c   :  { %2257 = vmatpush3.bf16.msra.mxu0 %v2415_v14  ;;  %2277 = vmatpush3.bf16.msra.mxu1 %v2412_v22  ;;  %v2435_v14 = vld [vmem:[%s3240_s3 + $0x230] sm:$0xff]   ;;  %v304_v16 = vmax.f32 %v302_v9, 0.0  ;;  %v305_v17 = vmax.f32 %v303_v11, 0.0  ;;  %v346_v18 = vadd.f32 %v344_v35, %v340_v36 }
  0x6d   :  { %2258 = vmatprep.subr.bf16.mxu0 %v2417_v15  ;;  %2278 = vmatprep.subr.bf16.mxu1 %v2414_v23  ;;  %v2437_v15 = vld [vmem:[%s3240_s3 + $0x278] sm:$0xff]   ;;  %v347_v19 = vadd.f32 %v345_v6, %v341_v37  ;;  %v2449_v11 = vld [vmem:[%s3240_s3 + $0x350] sm:$0xff]  }
  0x6e   :  { %v315_v20 = vrot.slane %v304_v16, %v2716_v42  ;;  %v323_v21 = vrot.slane %v305_v17, %v2716_v42  ;;  %v352_v22 = vadd.f32 %v350_v40, %v346_v18  ;;  %v2451_v18 = vld [vmem:[%s3240_s3 + $0x310] sm:$0xff]  }
  0x6f   :  { %v353_v23 = vadd.f32 %v351_v41, %v347_v19  ;;  %v2474_v19 = vld [vmem:[%s3237_s0 + $0x8] ss:$4 sm:$0x3] }
  0x70   :  { %2259 = vmatpush3.bf16.msra.mxu0 %v2419_v26  ;;  %2279 = vmatpush3.bf16.msra.mxu1 %v2416_v25  ;;  %v311_v25 = vrot.slane %v304_v16, %v2759_v10  ;;  %v319_v26 = vrot.slane %v305_v17, %v2759_v10  ;;  %v329_v28 = vpack.c.bf16 %v315_v20, %v315_v20  ;;  %v2473_v16 = vld [vmem:[%s3237_s0] ss:$4 sm:$0x3] }
  0x71   :  { %2260 = vmatprep.subr.bf16.mxu0 %v2421_v30  ;;  %2280 = vmatprep.subr.bf16.mxu1 %v2418_v32  ;;  %v331_v29 = vpack.c.bf16 %v323_v21, %v323_v21  ;;  %v356_v30 = vadd.f32 %v355_v43, %v352_v22  ;;  %v357_v31 = vadd.f32 %v355_v43, %v353_v23  ;;  %v2441_v32 = vld [vmem:[%s3240_s3 + $0x340] sm:$0xff]   ;;  %v387_v37 = vstv %s3055_s23  ;;  %v2476_v21 = vld [vmem:[%s3237_s0 + $0x9] ss:$4 sm:$0x3]  ;;  %v2453_v23 = vld [vmem:[%s3240_s3 + $0x358] sm:$0xff]  }
  0x72   :  { %v330_v39 = vpack.c.bf16 %v319_v26, %v319_v26  ;;  %v564_v45 = vunpack.c.l.b16 %v329_v28  ;;  %v388_v17 = vmul.f32 %v2473_v16, %v387_v37  ;;  %v389_v43 = vmul.f32 %v2474_v19, %v387_v37  ;;  %v2450_v26 = vld [vmem:[%s3240_s3 + $0x3d0] sm:$0xff]  }
  0x73   :  { %v566_v46 = vunpack.c.l.b16 %v331_v29  ;;  %v358_v47 = vmax.f32 %v356_v30, 0.0  ;;  %v2477_v30 = vld [vmem:[%s3237_s0 + $0x2] ss:$4 sm:$0x3] }
  0x74   :  { %2261 = vmatpush3.bf16.msra.mxu0 %v2423_v33  ;;  %2281 = vmatpush3.bf16.msra.mxu1 %v2420_v48  ;;  %v2438_v33 = vld [vmem:[%s3240_s3 + $0x2f8] sm:$0xff]   ;;  %v359_v48 = vmax.f32 %v357_v31, 0.0 }
  0x75   :  { %2262 = vmatprep.subr.bf16.mxu0 %v2425_v38  ;;  %2282 = vmatprep.subr.bf16.mxu1 %v2422_v49  ;;  %v328_v38 = vpack.c.bf16 %v311_v25, %v311_v25  ;;  %v369_v53 = vrot.slane %v358_v47, %v2716_v42  ;;  %v365_v55 = vrot.slane %v358_v47, %v2759_v10  ;;  %v2448_v25 = vld [vmem:[%s3240_s3 + $0x388] sm:$0xff]  }
  0x76   :  { %v377_v54 = vrot.slane %v359_v48, %v2716_v42  ;;  %v373_v57 = vrot.slane %v359_v48, %v2759_v10 }
  0x77   :  { %v563_v49 = vunpack.c.l.b16 %v328_v38  ;;  %v383_v60 = vpack.c.bf16 %v369_v53, %v369_v53  ;;  %v382_v62 = vpack.c.bf16 %v365_v55, %v365_v55  ;;  %v2457_v38 = vld [vmem:[%s3240_s3 + $0x360] sm:$0xff]  }
  0x78   :  { %2263 = vmatpush3.bf16.msra.mxu0 %v2427_v50  ;;  %2283 = vmatpush3.bf16.msra.mxu1 %v2424_v51  ;;  %v565_v50 = vunpack.c.l.b16 %v330_v39  ;;  %v2440_v51 = vld [vmem:[%s3240_s3 + $0x2b8] sm:$0xff]   ;;  %v385_v61 = vpack.c.bf16 %v377_v54, %v377_v54  ;;  %v384_v2 = vpack.c.bf16 %v373_v57, %v373_v57  ;;  %v2452_v39 = vld [vmem:[%s3240_s3 + $0x390] sm:$0xff]   ;;  %v2480_v54 = vld [vmem:[%s3237_s0 + $0xb] ss:$4 sm:$0x3]  ;;  %v441_v57 = vstv %s2032_s16 }
  0x79   :  { %2264 = vmatprep.subr.bf16.mxu0 %v2429_v52  ;;  %2284 = vmatprep.subr.bf16.mxu1 %v2426_v56  ;;  %v569_v52 = vrot.slane %v566_v46, 7  ;;  %v580_v4 = vunpack.c.l.b16 %v383_v60  ;;  %v579_v35 = vunpack.c.l.b16 %v382_v62  ;;  %v2459_v46 = vld [vmem:[%s3240_s3 + $0x320] sm:$0xff]   ;;  %v443_v60 = vmul.f32 %v2474_v19, %v441_v57 }
  0x7a   :  { %v567_v56 = vrot.slane %v565_v50, 7  ;;  %v582_v5 = vunpack.c.l.b16 %v385_v61  ;;  %v581_v6 = vunpack.c.l.b16 %v384_v2  ;;  %v403_v50 = vstv %s3120_s29 }
  0x7b   :  { %v570_v59 = vsel %vm503_vm0, %v569_v52, %v564_v45  ;;  %v2454_v45 = vld [vmem:[%s3240_s3 + $0x3d8] sm:$0xff]   ;;  %v2479_v52 = vld [vmem:[%s3237_s0 + $0x3] ss:$4 sm:$0x3]  ;;  %v405_v55 = vmul.f32 %v2480_v54, %v403_v50  ;;  %v445_v61 = vstv %s3136_s11  ;;  %v451_v62 = vstv %s3138_s12 }
  0x7c   :  { %2265 = vmatpush3.bf16.msra.mxu0 %v2431_v1  ;;  %2285 = vmatpush3.bf16.msra.mxu1 %v2428_v8  ;;  %v572_v0 = vpack.c.b16 %v570_v59, %v570_v59  ;;  %v568_v1 = vsel %vm503_vm0, %v567_v56, %v563_v49  ;;  %v585_v7 = vrot.slane %v582_v5, 7  ;;  %v2447_v8 = vld [vmem:[%s3240_s3 + $0x308] sm:$0xff]   ;;  %v583_v9 = vrot.slane %v581_v6, 7  ;;  %v2460_v6 = vld [vmem:[%s3240_s3 + $0x3a0] sm:$0xff]  }
  0x7d   :  { %2266 = vmatprep.subr.bf16.mxu0 %v2433_v34  ;;  %2286 = vmatprep.subr.bf16.mxu1 %v2430_v12  ;;  %v571_v34 = vpack.c.b16 %v568_v1, %v568_v1  ;;  %v391_v12 = vstv %s3057_s24  ;;  %v2461_v49 = vld [vmem:[%s3240_s3 + $0x368] sm:$0xff]   ;;  %v404_v53 = vmul.f32 %v2479_v52, %v403_v50  ;;  %v409_v56 = vstv %s3131_s15 }
  0x7e   :  { %1846 = vmatprep.mubr.bf16.mxu0 %v572_v0  ;;  %v586_v36 = vsel %vm503_vm0, %v585_v7, %v580_v4  ;;  %v584_v41 = vsel %vm503_vm0, %v583_v9, %v579_v35  ;;  %v393_v22 = vmul.f32 %v2476_v21, %v391_v12  ;;  %v442_v59 = vmul.f32 %v2473_v16, %v441_v57  ;;  %v2465_v4 = vld [vmem:[%s3240_s3 + $0x370] sm:$0xff]   ;;  %v2469_v16 = vld [vmem:[%s3240_s3 + $0x378] sm:$0xff]  }
  0x7f   :  { %v588_v40 = vpack.c.b16 %v586_v36, %v586_v36  ;;  %v452_v5 = vmul.f32 %v2477_v30, %v451_v62  ;;  %v457_v35 = vstv %s3143_s19  ;;  %v2462_v36 = vld [vmem:[%s3240_s3 + $0x3e8] sm:$0xff]  }
  0x80   :  { %2267 = vmatpush3.bf16.msra.mxu0 %v2435_v14  ;;  %2287 = vmatpush3.bf16.msra.mxu1 %v2432_v13  ;;  %v2444_v13 = vld [vmem:[%s3240_s3 + $0x380] sm:$0xff]   ;;  %v587_v14 = vpack.c.b16 %v584_v41, %v584_v41  ;;  %v395_v29 = vadd.f32 %v393_v22, %v389_v43  ;;  %v458_v37 = vmul.f32 %v2479_v52, %v457_v35 }
  0x81   :  { %2268 = vmatprep.subr.bf16.mxu0 %v2437_v15  ;;  %2288 = vmatprep.subr.bf16.mxu1 %v2434_v44  ;;  %v2446_v15 = vld [vmem:[%s3240_s3 + $0x3c8] sm:$0xff]   ;;  %v2475_v44 = vld [vmem:[%s3237_s0 + $0x1] ss:$4 sm:$0x3] }
  0x82   :  { %1886 = vmatprep.mubr.bf16.mxu1 %v588_v40  ;;  %v392_v20 = vmul.f32 %v2475_v44, %v391_v12  ;;  %v446_v2 = vmul.f32 %v2475_v44, %v445_v61  ;;  %v459_v12 = vmul.f32 %v2480_v54, %v457_v35  ;;  %v2467_v40 = vld [vmem:[%s3240_s3 + $0x330] sm:$0xff]   ;;  %v2472_v54 = vld [vmem:[%s3240_s3 + $0x3b8] sm:$0xff]  }
  0x84   :  { %2269 = vmatpush3.bf16.msra.mxu0 %v2439_v24  ;;  %2289 = vmatpush3.bf16.msra.mxu1 %v2436_v27  ;;  %v397_v24 = vstv %s3077_s6  ;;  %v2455_v27 = vld [vmem:[%s3240_s3 + $0x318] sm:$0xff]   ;;  %v394_v28 = vadd.f32 %v392_v20, %v388_v17  ;;  %v448_v9 = vadd.f32 %v446_v2, %v442_v59  ;;  %v463_v17 = vstv %s3155_s26 }
  0x85   :  { %2298 = vmatprep.subr.bf16.mxu0 %v2441_v32  ;;  %2290 = vmatprep.subr.bf16.mxu1 %v2438_v33  ;;  %v398_v31 = vmul.f32 %v2477_v30, %v397_v24  ;;  %v2478_v32 = vld [vmem:[%s3237_s0 + $0xa] ss:$4 sm:$0x3] }
  0x86   :  { %v399_v33 = vmul.f32 %v2478_v32, %v397_v24  ;;  %v2471_v24 = vld [vmem:[%s3240_s3 + $0x338] sm:$0xff]  }
  0x87   :  { %1847 = vmatmul.mubr.bf16.vlgmr.msra.gmra.mrb[8].mxu0 %v571_v34  ;;  %v400_v47 = vadd.f32 %v398_v31, %v394_v28  ;;  %v453_v34 = vmul.f32 %v2478_v32, %v451_v62  ;;  %v2468_v31 = vld [vmem:[%s3240_s3 + $0x3b0] sm:$0xff]  }
  0x88   :  { %2291 = vmatpush3.bf16.msra.mxu1 %v2440_v51  ;;  %2299 = vmatpush3.bf16.msra.mxu0 %v2443_v63  ;;  %v401_v48 = vadd.f32 %v399_v33, %v395_v29  ;;  %v2456_v51 = vld [vmem:[%s3240_s3 + $0x398] sm:$0xff]   ;;  %v2463_v63 = vld [vmem:[%s3240_s3 + $0x328] sm:$0xff]  }
  0x89   :  { %2320 = vmatprep.subr.bf16.mxu1 %v2442_v58  ;;  %2300 = vmatprep.subr.bf16.mxu0 %v2445_v3  ;;  %v2458_v58 = vld [vmem:[%s3240_s3 + $0x3e0] sm:$0xff]   ;;  %v406_v0 = vadd.f32 %v404_v53, %v400_v47  ;;  %v447_v3 = vmul.f32 %v2476_v21, %v445_v61  ;;  %v2466_v21 = vld [vmem:[%s3240_s3 + $0x3f0] sm:$0xff]  }
  0x8a   :  { %v407_v1 = vadd.f32 %v405_v55, %v401_v48 }
  0x8b   :  { %1887 = vmatmul.mubr.bf16.vlgmr.msra.gmra.mrb[8].mxu1 %v587_v14  ;;  %v410_v7 = vadd.f32 %v409_v56, %v406_v0  ;;  %v454_v14 = vadd.f32 %v452_v5, %v448_v9 }
  0x8c   :  { %2301 = vmatpush3.bf16.msra.mxu0 %v2447_v8  ;;  %2321 = vmatpush3.bf16.msra.mxu1 %v2444_v13  ;;  %v411_v8 = vadd.f32 %v409_v56, %v407_v1 }
  0x8d   :  { %2302 = vmatprep.subr.bf16.mxu0 %v2449_v11  ;;  %2322 = vmatprep.subr.bf16.mxu1 %v2446_v15  ;;  %v449_v11 = vadd.f32 %v447_v3, %v443_v60  ;;  %v412_v41 = vmax.f32 %v410_v7, 0.0  ;;  %v460_v44 = vadd.f32 %v458_v37, %v454_v14  ;;  %v2037_v7 = vld [vmem:[%s3241_s4] ss:$0 sm:$0xff]  ;;  %s2535_s4 = smov [#allocation7]  }
  0x8e   :  { %v413_v13 = vmax.f32 %v411_v8, 0.0  ;;  %s1982_s7 = sshll.u32 %s2535_s4, 4  ;;  %s1983_s7 = int_to_ptr.vmem [resolvable:$true] %s1982_s7 }
  0x8f   :  { %v455_v15 = vadd.f32 %v453_v34, %v449_v11  ;;  %v423_v19 = vrot.slane %v412_v41, %v2716_v42  ;;  %v419_v22 = vrot.slane %v412_v41, %v2759_v10  ;;  %s2505_s29 = scalar_lea.vmem %s1983_s7, 32  ;;  %p2510_p11 = scmp.lt.s32.totalorder %s1983_s7, %s1983_s7 }
  0x90   :  { %2303 = vmatpush3.bf16.msra.mxu0 %v2451_v18  ;;  %2323 = vmatpush3.bf16.msra.mxu1 %v2448_v25  ;;  %v2464_v18 = vld [vmem:[%s3240_s3 + $0x3a8] sm:$0xff]   ;;  %v431_v43 = vrot.slane %v413_v13, %v2716_v42  ;;  %p2506_p10 = scmp.ne.s32.totalorder %s1983_s7, %s2505_s29  ;;  %p2511_p12 = scmp.lt.s32.totalorder %s2505_s29, %s2505_s29 }
  0x91   :  { %2304 = vmatprep.subr.bf16.mxu0 %v2453_v23  ;;  %2324 = vmatprep.subr.bf16.mxu1 %v2450_v26  ;;  %v461_v20 = vadd.f32 %v459_v12, %v455_v15  ;;  %v427_v23 = vrot.slane %v413_v13, %v2759_v10  ;;  %v437_v25 = vpack.c.bf16 %v423_v19, %v423_v19 }
  0x92   :  { %v439_v26 = vpack.c.bf16 %v431_v43, %v431_v43  ;;  %v436_v29 = vpack.c.bf16 %v419_v22, %v419_v22  ;;  %p2512_p13 = por %p2511_p12, %p2510_p11 }
  0x93   :  { %v465_v28 = vadd.f32 %v463_v17, %v461_v20  ;;  %v438_v30 = vpack.c.bf16 %v427_v23, %v427_v23  ;;  %v596_v32 = vunpack.c.l.b16 %v437_v25 }
  0x94   :  { %2305 = vmatpush3.bf16.msra.mxu0 %v2455_v27  ;;  %2325 = vmatpush3.bf16.msra.mxu1 %v2452_v39  ;;  %v464_v27 = vadd.f32 %v463_v17, %v460_v44  ;;  %v598_v33 = vunpack.c.l.b16 %v439_v26  ;;  %p2513_p0 = pnand %p2512_p13, %p2506_p10 }
  0x95   :  { %2306 = vmatprep.subr.bf16.mxu0 %v2457_v38  ;;  %2326 = vmatprep.subr.bf16.mxu1 %v2454_v45  ;;  %v467_v39 = vmax.f32 %v465_v28, 0.0  ;;  %v2470_v45 = vld [vmem:[%s3240_s3 + $0x3f8] sm:$0xff]   ;;  %v597_v47 = vunpack.c.l.b16 %v438_v30 }
  0x96   :  { %v466_v38 = vmax.f32 %v464_v27, 0.0  ;;  %v601_v48 = vrot.slane %v598_v33, 7 }
  0x97   :  { %v485_v50 = vrot.slane %v467_v39, %v2716_v42  ;;  %v599_v52 = vrot.slane %v597_v47, 7  ;;  %v481_v53 = vrot.slane %v467_v39, %v2759_v10 }
  0x98   :  { %2307 = vmatpush3.bf16.msra.mxu0 %v2459_v46  ;;  %2327 = vmatpush3.bf16.msra.mxu1 %v2456_v51  ;;  %v595_v46 = vunpack.c.l.b16 %v436_v29  ;;  %v473_v51 = vrot.slane %v466_v38, %v2759_v10  ;;  %v602_v55 = vsel %vm503_vm0, %v601_v48, %v596_v32 }
  0x99   :  { %2308 = vmatprep.subr.bf16.mxu0 %v2461_v49  ;;  %2328 = vmatprep.subr.bf16.mxu1 %v2458_v58  ;;  %v477_v49 = vrot.slane %v466_v38, %v2716_v42  ;;  %v493_v57 = vpack.c.bf16 %v485_v50, %v485_v50  ;;  %v604_v59 = vpack.c.b16 %v602_v55, %v602_v55 }
  0x9a   :  { %v490_v58 = vpack.c.bf16 %v473_v51, %v473_v51  ;;  %v600_v60 = vsel %vm503_vm0, %v599_v52, %v595_v46  ;;  %v492_v42 = vpack.c.bf16 %v481_v53, %v481_v53 }
  0x9b   :  { %v491_v56 = vpack.c.bf16 %v477_v49, %v477_v49  ;;  %v614_v62 = vunpack.c.l.b16 %v493_v57  ;;  %1926 = vmatprep.mubr.bf16.mxu0 %v604_v59 }
  0x9c   :  { %2309 = vmatpush3.bf16.msra.mxu0 %v2463_v63  ;;  %2329 = vmatpush3.bf16.msra.mxu1 %v2460_v6  ;;  %v603_v63 = vpack.c.b16 %v600_v60, %v600_v60  ;;  %v611_v10 = vunpack.c.l.b16 %v490_v58  ;;  %v613_v0 = vunpack.c.l.b16 %v492_v42 }
  0x9d   :  { %2310 = vmatprep.subr.bf16.mxu0 %v2465_v4  ;;  %2330 = vmatprep.subr.bf16.mxu1 %v2462_v36  ;;  %v612_v61 = vunpack.c.l.b16 %v491_v56  ;;  %v617_v1 = vrot.slane %v614_v62, 7 }
  0x9e   :  { %v615_v2 = vrot.slane %v613_v0, 7 }
  0x9f   :  { %v618_v3 = vsel %vm503_vm0, %v617_v1, %v612_v61 }
  0xa0   :  { %2311 = vmatpush3.bf16.msra.mxu0 %v2467_v40  ;;  %2331 = vmatpush3.bf16.msra.mxu1 %v2464_v18  ;;  %v620_v4 = vpack.c.b16 %v618_v3, %v618_v3  ;;  %v616_v5 = vsel %vm503_vm0, %v615_v2, %v611_v10 }
  0xa1   :  { %2312 = vmatprep.subr.bf16.mxu0 %v2469_v16  ;;  %2332 = vmatprep.subr.bf16.mxu1 %v2466_v21  ;;  %v619_v34 = vpack.c.b16 %v616_v5, %v616_v5 }
  0xa2   :  { %1966 = vmatprep.mubr.bf16.mxu1 %v620_v4 }
  0xa4   :  { %2313 = vmatpush3.bf16.msra.mxu0 %v2471_v24  ;;  %2333 = vmatpush3.bf16.msra.mxu1 %v2468_v31 }
  0xa5   :  { %2334 = vmatprep.subr.bf16.mxu1 %v2470_v45 }
  0xa7   :  { %1927 = vmatmul.mubr.bf16.vlgmr.msra.gmra.mrb[12].mxu0 %v603_v63 }
  0xa8   :  { %2335 = vmatpush3.bf16.msra.mxu1 %v2472_v54 }
  0xab   :  { %1967 = vmatmul.mubr.bf16.vlgmr.msra.gmra.mrb[12].mxu1 %v619_v34 }
 0x11a   :  { %v2182_v35 = vpop.f32.mrb[0].mxu0 }
 0x11b   :  { %v2183_v6 = vpop.f32.mrb[1].mxu0 }
 0x11c   :  { %v2184_v8 = vadd.f32 %v2183_v6, %v2182_v35  ;;  %v2185_v9 = vpop.f32.mrb[2].mxu0 }
 0x11d   :  { %v2186_v11 = vpop.f32.mrb[3].mxu0 }
 0x11e   :  { %v2204_v36 = vpop.f32.mrb[0].mxu1  ;;  %v1689_v37 = vadd.f32 %v2184_v8, %v2037_v7 }
 0x11f   :  { %v2205_v12 = vpop.f32.mrb[1].mxu1 }
 0x120   :  { %v2206_v40 = vadd.f32 %v2205_v12, %v2204_v36  ;;  %v2207_v41 = vpop.f32.mrb[2].mxu1 }
 0x121   :  { %v2208_v13 = vpop.f32.mrb[3].mxu1 }
 0x122   :  { %v1729_v14 = vadd.f32 %v2206_v40, %v1689_v37 }
 0x13a   :  { %v2226_v15 = vpop.f32.mrb[4].mxu0 }
 0x13b   :  { %v2227_v16 = vpop.f32.mrb[5].mxu0 }
 0x13c   :  { %v2228_v17 = vadd.f32 %v2227_v16, %v2226_v15  ;;  %v2229_v18 = vpop.f32.mrb[6].mxu0 }
 0x13d   :  { %v2230_v19 = vpop.f32.mrb[7].mxu0 }
 0x13e   :  { %v1769_v43 = vadd.f32 %v2228_v17, %v1729_v14  ;;  %v2248_v44 = vpop.f32.mrb[4].mxu1 }
 0x13f   :  { %v2249_v20 = vpop.f32.mrb[5].mxu1 }
 0x140   :  { %v2250_v21 = vadd.f32 %v2249_v20, %v2248_v44  ;;  %v2251_v22 = vpop.f32.mrb[6].mxu1 }
 0x141   :  { %v2252_v23 = vpop.f32.mrb[7].mxu1 }
 0x142   :  { %v1809_v24 = vadd.f32 %v2250_v21, %v1769_v43 }
 0x15a   :  { %v2270_v25 = vpop.f32.mrb[8].mxu0 }
 0x15b   :  { %v2271_v26 = vpop.f32.mrb[9].mxu0 }
 0x15c   :  { %v2272_v27 = vadd.f32 %v2271_v26, %v2270_v25  ;;  %v2273_v28 = vpop.f32.mrb[10].mxu0 }
 0x15d   :  { %v2274_v29 = vpop.f32.mrb[11].mxu0 }
 0x15e   :  { %v1849_v30 = vadd.f32 %v2272_v27, %v1809_v24  ;;  %v2292_v31 = vpop.f32.mrb[8].mxu1 }
 0x15f   :  { %v2293_v32 = vpop.f32.mrb[9].mxu1 }
 0x160   :  { %v2294_v33 = vadd.f32 %v2293_v32, %v2292_v31  ;;  %v2295_v38 = vpop.f32.mrb[10].mxu1 }
 0x161   :  { %v2296_v39 = vpop.f32.mrb[11].mxu1 }
 0x162   :  { %v1889_v45 = vadd.f32 %v2294_v33, %v1849_v30 }
 0x17a   :  { %v2314_v46 = vpop.f32.mrb[12].mxu0 }
 0x17b   :  { %v2315_v47 = vpop.f32.mrb[13].mxu0 }
 0x17c   :  { %v2316_v48 = vadd.f32 %v2315_v47, %v2314_v46  ;;  %v2317_v49 = vpop.f32.mrb[14].mxu0 }
 0x17d   :  { %v2318_v50 = vpop.f32.mrb[15].mxu0 }
 0x17e   :  { %v1929_v51 = vadd.f32 %v2316_v48, %v1889_v45  ;;  %v2336_v52 = vpop.f32.mrb[12].mxu1 }
 0x17f   :  { %v2337_v53 = vpop.f32.mrb[13].mxu1 }
 0x180   :  { %v2338_v54 = vadd.f32 %v2337_v53, %v2336_v52  ;;  %v2339_v55 = vpop.f32.mrb[14].mxu1 }
 0x181   :  { %v2340_v56 = vpop.f32.mrb[15].mxu1 }
 0x182   :  { %v1969_v57 = vadd.f32 %v2338_v54, %v1929_v51 }
 0x184   :  { %1975 = vst.msk [vmem:[#allocation7] sm:$0x3] %vm1974_vm1, %v1969_v57 }
 0x185   :  { %2516 = shalt.err (!%p2513_p0)
}
 0x186   :  { %s2517_s9 = scalar_lea.hbm %s3242_s5, 32 }
 0x187   :  { %p2518_p1 = scmp.ne.s32.totalorder %s3242_s5, %s2517_s9  ;;  %p2521_p2 = scmp.lt.u32.totalorder %s2517_s9, %s3242_s5 }
 0x189   :  { %p2523_p3 = pnand %p2521_p2, %p2518_p1 }
 0x18b   :  { %2526 = shalt.err (!%p2523_p3)
}
 0x18c   :  { %1985 = dma.vmem_to_hbm [thread:$0]  %s1983_s7, 32, %s3242_s5, [#allocation3]  }
 0x18d   :  { %2531 = dma.done.wait [#allocation3], 32  }
 0x18e   :  { %2532 = vsyncadd [#allocation3], 4294967264 }
 0x18f   :  { %1989 = vsyncpa [#allocation3], 1 }
 0x190   :  { %1990 = vsyncpa [#allocation4], 1 }
 0x191   :  { %1991 = vsyncpa [#allocation6], 1 }

</bundles_post_ra>
